<compile_context>
chip_gen: v7x
topology: tpu7x:2x2x1
jax: 0.10.0
libtpu: 0.0.40
codegen_flags: <defaults>
</compile_context>

<pallas_src>
import jax
import jax.numpy as jnp
from jax.experimental import pallas as pl
from jax.experimental.pallas import tpu as pltpu


def _round_up(x: int, m: int) -> int:
    return ((x + m - 1) // m) * m


def _make_kernel(nb_classes: int, mrg: float, alpha: float,
                 c_tile: int, use_bf16_matmul: bool):
    eps2 = 1e-24  # (1e-12)**2 -> matches F.normalize's norm clamp at 1e-12

    def kernel(x_ref, p_ref, t_ref, w_ref,           # inputs
               pos_log_ref, neg_log_ref,             # outputs (per-class logs)
               p_acc, n_acc, pn_cache):              # VMEM scratch
        ci = pl.program_id(0)   # class-tile index  ('parallel')
        ni = pl.program_id(1)   # batch-tile index  ('arbitrary' reduction)

        # ---- per class tile init: zero accumulators, cache normalized proxies
        @pl.when(ni == 0)
        def _():
            p_acc[...] = jnp.zeros_like(p_acc)
            n_acc[...] = jnp.zeros_like(n_acc)
            P = p_ref[...]                                          # (c_tile, D)
            p_inv = jax.lax.rsqrt(
                jnp.maximum(jnp.sum(P * P, axis=-1, keepdims=True),
                            jnp.float32(eps2)))
            pn_cache[...] = P * p_inv

        X = x_ref[...]          # (n_tile, D) f32
        T = t_ref[...]          # (n_tile, 1) i32
        w = w_ref[...]          # (n_tile, 1) f32  (0 on padded rows)

        x_inv = jax.lax.rsqrt(
            jnp.maximum(jnp.sum(X * X, axis=-1, keepdims=True),
                        jnp.float32(eps2)))
        Xn = X * x_inv
        Pn = pn_cache[...]

        if use_bf16_matmul:     # optional bf16 MXU path (accuracy trade-off)
            Xn = Xn.astype(jnp.bfloat16)
            Pn = Pn.astype(jnp.bfloat16)

        # cos = F.linear(X, P) restricted to this (n_tile, c_tile) tile
        cos = jnp.dot(Xn, Pn.T, preferred_element_type=jnp.float32)

        # boolean one-hot mask: class id (global) == label
        cls = jax.lax.broadcasted_iota(jnp.int32, cos.shape, 1) + ci * c_tile
        mask = cls == T                                         # (n_tile, c_tile)

        # single dense exp pass (negatives only)
        neg = w * jnp.exp(alpha * (cos + mrg))                  # (n_tile, c_tile)

        # positives: one exp per row on the label-gathered cosine.  Rows whose
        # label is outside this class tile have an all-false mask row, so their
        # (unused) pos_row value never reaches the accumulator.
        cos_pos = jnp.sum(jnp.where(mask, cos, 0.0), axis=1, keepdims=True)
        pos_row = w * jnp.exp(-alpha * (cos_pos - mrg))         # (n_tile, 1)

        p_acc[...] += jnp.sum(jnp.where(mask, pos_row, 0.0),
                              axis=0, keepdims=True)            # (1, c_tile)
        n_acc[...] += jnp.sum(jnp.where(mask, 0.0, neg),
                              axis=0, keepdims=True)            # (1, c_tile)

        # ---- finalize: per-class logs; mask lane-padded classes out of the
        #      negative term (padded classes have p_acc == 0 -> log(1+0) == 0).
        @pl.when(ni == pl.num_programs(1) - 1)
        def _():
            col = (jax.lax.broadcasted_iota(jnp.int32, (1, c_tile), 1)
                   + ci * c_tile)
            class_valid = col < nb_classes
            pos_log_ref[...] = jnp.log(1.0 + p_acc[...])
            neg_log_ref[...] = jnp.where(class_valid,
                                         jnp.log(1.0 + n_acc[...]), 0.0)

    return kernel


def proxy_anchor_reweight_loss(X, T, weights, proxies,
                               mrg: float = 0.1, alpha: float = 32.0,
                               n_tile: int | None = None,
                               c_tile: int | None = None,
                               use_bf16_matmul: bool = False):
    """Pallas-backed ProxyAnchor_reweight forward.

    X:       (N, D) float32 embeddings
    T:       (N,)   int32 class labels
    weights: (N,)   float32 per-sample weights
    proxies: (C, D) float32 learnable proxies
    returns scalar float32 loss
    """
    N, D = X.shape
    C = proxies.shape[0]

    # Tile selection: lane-dense class tiles (multiples of 128).  The 512
    # default keeps the f32 (n_tile, c_tile) working set x double-buffering
    # comfortably under v7x's 32 MiB scoped / 64 MiB physical VMEM; v5e/v6e
    # tolerate larger class tiles.
    if c_tile is None:
        c_tile = min(_round_up(C, 128), 512)
    if n_tile is None:
        n_tile = min(_round_up(N, 8), 128)
    C_pad = _round_up(C, c_tile)
    N_pad = _round_up(N, n_tile)

    # Pad: padded rows get weight 0 (and label 0), so they contribute nothing;
    # padded classes (zero proxies) are masked out of neg_term at finalize.
    X_p = jnp.zeros((N_pad, D), jnp.float32).at[:N].set(X.astype(jnp.float32))
    P_p = jnp.zeros((C_pad, D), jnp.float32).at[:C].set(
        proxies.astype(jnp.float32))
    T_p = jnp.zeros((N_pad, 1), jnp.int32).at[:N, 0].set(T.astype(jnp.int32))
    W_p = jnp.zeros((N_pad, 1), jnp.float32).at[:N, 0].set(
        weights.astype(jnp.float32))

    num_c_tiles = C_pad // c_tile
    num_n_tiles = N_pad // n_tile

    kernel = _make_kernel(C, float(mrg), float(alpha), c_tile, use_bf16_matmul)

    grid_spec = pltpu.PrefetchScalarGridSpec(
        num_scalar_prefetch=0,
        grid=(num_c_tiles, num_n_tiles),
        in_specs=[
            pl.BlockSpec((n_tile, D), lambda ci, ni: (ni, 0)),   # X
            pl.BlockSpec((c_tile, D), lambda ci, ni: (ci, 0)),   # proxies
            pl.BlockSpec((n_tile, 1), lambda ci, ni: (ni, 0)),   # labels
            pl.BlockSpec((n_tile, 1), lambda ci, ni: (ni, 0)),   # weights
        ],
        out_specs=[
            pl.BlockSpec((1, c_tile), lambda ci, ni: (0, ci)),   # log(1+p_sim)
            pl.BlockSpec((1, c_tile), lambda ci, ni: (0, ci)),   # log(1+n_sim)
        ],
        scratch_shapes=[
            pltpu.VMEM((1, c_tile), jnp.float32),                # p_acc
            pltpu.VMEM((1, c_tile), jnp.float32),                # n_acc
            pltpu.VMEM((c_tile, D), jnp.float32),                # normalized P
        ],
    )

    pos_log, neg_log = pl.pallas_call(
        kernel,
        out_shape=(jax.ShapeDtypeStruct((1, C_pad), jnp.float32),
                   jax.ShapeDtypeStruct((1, C_pad), jnp.float32)),
        grid_spec=grid_spec,
        compiler_params=pltpu.CompilerParams(
            dimension_semantics=("parallel", "arbitrary"),
            vmem_limit_bytes=32 * 1024 * 1024),
    )(X_p, P_p, T_p, W_p)

    # Tiny O(C) epilogue in plain JAX: count classes with >=1 positive sample
    # (depends only on T) and reduce the per-class logs to the scalar loss.
    counts = jnp.zeros((C,), jnp.float32).at[T.astype(jnp.int32)].add(1.0)
    num_valid = jnp.maximum(jnp.sum((counts > 0).astype(jnp.float32)), 1.0)

    pos_term = jnp.sum(pos_log) / num_valid
    neg_term = jnp.sum(neg_log) / jnp.float32(C)
    return pos_term + neg_term


def proxy_anchor_reweight_loss_ref(X, T, weights, proxies,
                                   mrg=0.1, alpha=32.0):
    """Plain-JAX reference (mirrors the PyTorch forward)."""
    nb_classes = proxies.shape[0]
    Pn = proxies / jnp.maximum(
        jnp.linalg.norm(proxies, axis=-1, keepdims=True), 1e-12)
    Xn = X / jnp.maximum(jnp.linalg.norm(X, axis=-1, keepdims=True), 1e-12)
    cos = Xn @ Pn.T
    p_one_hot = jax.nn.one_hot(T, nb_classes, dtype=jnp.float32)
    n_one_hot = 1.0 - p_one_hot
    pos_exp = weights[:, None] * jnp.exp(-alpha * (cos - mrg))
    neg_exp = weights[:, None] * jnp.exp(alpha * (cos + mrg))
    num_valid = jnp.sum(jnp.sum(p_one_hot, axis=0) != 0)
    p_sim_sum = jnp.sum(jnp.where(p_one_hot == 1.0, pos_exp, 0.0), axis=0)
    n_sim_sum = jnp.sum(jnp.where(n_one_hot == 1.0, neg_exp, 0.0), axis=0)
    pos_term = jnp.sum(jnp.log1p(p_sim_sum)) / num_valid
    neg_term = jnp.sum(jnp.log1p(n_sim_sum)) / nb_classes
    return pos_term + neg_term


if __name__ == "__main__":
    # Small, deterministic problem that still exercises the tiled grid:
    # 3 batch tiles x 2 class tiles, with class padding 200 -> 256.
    nb_classes = 200
    sz_embed = 32
    N = 24

    key = jax.random.PRNGKey(0)
    kx, kp, kt, kw = jax.random.split(key, 4)

    X = jax.random.normal(kx, (N, sz_embed), dtype=jnp.float32)
    proxies = jax.random.normal(kp, (nb_classes, sz_embed), dtype=jnp.float32)
    T = jax.random.randint(kt, (N,), 0, nb_classes, dtype=jnp.int32)
    weights = jax.random.uniform(kw, (N,), dtype=jnp.float32,
                                 minval=0.5, maxval=1.5)
    # `indices` argument of the PyTorch forward is unused, so it is omitted.

    loss = proxy_anchor_reweight_loss(X, T, weights, proxies,
                                      mrg=0.1, alpha=32.0,
                                      n_tile=8, c_tile=128)
    loss = jax.block_until_ready(loss)

    ref = proxy_anchor_reweight_loss_ref(X, T, weights, proxies,
                                         mrg=0.1, alpha=32.0)
    ref = jax.block_until_ready(ref)

    assert jnp.allclose(loss, ref, rtol=2e-4, atol=2e-4), (loss, ref)
    print("KERNEL_OK")
</pallas_src>

<mosaic_0001>
module attributes {stable_mosaic.version = 11 : i64} {
  func.func @kernel(%arg0: i32, %arg1: i32, %arg2: memref<8x32xf32, #tpu.memory_space<vmem>>, %arg3: memref<128x32xf32, #tpu.memory_space<vmem>>, %arg4: memref<8x1xi32, #tpu.memory_space<vmem>>, %arg5: memref<8x1xf32, #tpu.memory_space<vmem>>, %arg6: memref<1x128xf32, #tpu.memory_space<vmem>>, %arg7: memref<1x128xf32, #tpu.memory_space<vmem>>, %arg8: memref<1x128xf32, #tpu.memory_space<vmem>>, %arg9: memref<1x128xf32, #tpu.memory_space<vmem>>, %arg10: memref<128x32xf32, #tpu.memory_space<vmem>>) attributes {dimension_semantics = [#tpu.dimension_semantics<parallel>, #tpu.dimension_semantics<arbitrary>], iteration_bounds = array<i64: 2, 3>, scalar_prefetch = 0 : i64, scratch_operands = 3 : i64, tpu.core_type = #tpu.core_type<tc>, window_params = [{transform_indices = @transform_0, window_bounds = array<i64: 8, 32>}, {transform_indices = @transform_1, window_bounds = array<i64: 128, 32>}, {transform_indices = @transform_2, window_bounds = array<i64: 8, 1>}, {transform_indices = @transform_3, window_bounds = array<i64: 8, 1>}, {transform_indices = @transform_4, window_bounds = array<i64: 1, 128>}, {transform_indices = @transform_5, window_bounds = array<i64: 1, 128>}]} {
    %c0_i32 = arith.constant 0 : i32
    %0 = arith.cmpi eq, %arg1, %c0_i32 : i32
    %1 = arith.extui %0 : i1 to i32
    %c0_i32_0 = arith.constant 0 : i32
    %2 = arith.cmpi ne, %1, %c0_i32_0 : i32
    scf.if %2 {
      %cst_29 = arith.constant 0.000000e+00 : f32
      %59 = vector.broadcast %cst_29 : f32 to vector<1x128xf32>
      %c0_30 = arith.constant 0 : index
      %c0_31 = arith.constant 0 : index
      %60 = vector.load %arg8[%c0_30, %c0_31] : memref<1x128xf32, #tpu.memory_space<vmem>>, vector<1x128xf32>
      tpu.vector_store %arg8[%c0_30, %c0_31], %59 {strides = array<i32>} : memref<1x128xf32, #tpu.memory_space<vmem>>, vector<1x128xf32>,
      %cst_32 = arith.constant 0.000000e+00 : f32
      %61 = vector.broadcast %cst_32 : f32 to vector<1x128xf32>
      %c0_33 = arith.constant 0 : index
      %c0_34 = arith.constant 0 : index
      %62 = vector.load %arg9[%c0_33, %c0_34] : memref<1x128xf32, #tpu.memory_space<vmem>>, vector<1x128xf32>
      tpu.vector_store %arg9[%c0_33, %c0_34], %61 {strides = array<i32>} : memref<1x128xf32, #tpu.memory_space<vmem>>, vector<1x128xf32>,
      %c0_35 = arith.constant 0 : index
      %c0_36 = arith.constant 0 : index
      %63 = vector.load %arg3[%c0_35, %c0_36] : memref<128x32xf32, #tpu.memory_space<vmem>>, vector<128x32xf32>
      %64 = arith.mulf %63, %63 : vector<128x32xf32>
      %cst_37 = arith.constant dense<0.000000e+00> : vector<128xf32>
      %65 = vector.multi_reduction <add>, %64, %cst_37 [1] : vector<128x32xf32> to vector<128xf32>
      %66 = vector.shape_cast %65 : vector<128xf32> to vector<128x1xf32>
      %cst_38 = arith.constant 1.000000e-24 : f32
      %67 = vector.broadcast %cst_38 : f32 to vector<128x1xf32>
      %68 = arith.maximumf %66, %67 : vector<128x1xf32>
      %69 = math.rsqrt %68 : vector<128x1xf32>
      %70 = vector.broadcast %69 : vector<128x1xf32> to vector<128x32xf32>
      %71 = arith.mulf %63, %70 : vector<128x32xf32>
      %c0_39 = arith.constant 0 : index
      %c0_40 = arith.constant 0 : index
      %72 = vector.load %arg10[%c0_39, %c0_40] : memref<128x32xf32, #tpu.memory_space<vmem>>, vector<128x32xf32>
      tpu.vector_store %arg10[%c0_39, %c0_40], %71 {strides = array<i32>} : memref<128x32xf32, #tpu.memory_space<vmem>>, vector<128x32xf32>,
    } else {
    }
    %c0 = arith.constant 0 : index
    %c0_1 = arith.constant 0 : index
    %3 = vector.load %arg2[%c0, %c0_1] : memref<8x32xf32, #tpu.memory_space<vmem>>, vector<8x32xf32>
    %c0_2 = arith.constant 0 : index
    %c0_3 = arith.constant 0 : index
    %4 = vector.load %arg4[%c0_2, %c0_3] : memref<8x1xi32, #tpu.memory_space<vmem>>, vector<8x1xi32>
    %c0_4 = arith.constant 0 : index
    %c0_5 = arith.constant 0 : index
    %5 = vector.load %arg5[%c0_4, %c0_5] : memref<8x1xf32, #tpu.memory_space<vmem>>, vector<8x1xf32>
    %6 = arith.mulf %3, %3 : vector<8x32xf32>
    %cst = arith.constant dense<0.000000e+00> : vector<8xf32>
    %7 = vector.multi_reduction <add>, %6, %cst [1] : vector<8x32xf32> to vector<8xf32>
    %8 = vector.shape_cast %7 : vector<8xf32> to vector<8x1xf32>
    %cst_6 = arith.constant 1.000000e-24 : f32
    %9 = vector.broadcast %cst_6 : f32 to vector<8x1xf32>
    %10 = arith.maximumf %8, %9 : vector<8x1xf32>
    %11 = math.rsqrt %10 : vector<8x1xf32>
    %12 = vector.broadcast %11 : vector<8x1xf32> to vector<8x32xf32>
    %13 = arith.mulf %3, %12 : vector<8x32xf32>
    %c0_7 = arith.constant 0 : index
    %c0_8 = arith.constant 0 : index
    %14 = vector.load %arg10[%c0_7, %c0_8] : memref<128x32xf32, #tpu.memory_space<vmem>>, vector<128x32xf32>
    %15 = tpu.transpose %14, [1, 0] : vector<128x32xf32> -> vector<32x128xf32>
    %cst_9 = arith.constant dense<0.000000e+00> : vector<8x128xf32>
    %16 = tpu.matmul %13, %15, %cst_9 {dimension_numbers = #tpu.dot_dimension_numbers<[1], [0], [0], [1], [0, 0, 1, 1], [], []>} : vector<8x32xf32>, vector<32x128xf32>, vector<8x128xf32> -> vector<8x128xf32>
    %17 = tpu.iota {dimensions = array<i32: 1>} : vector<8x128xi32>
    %c128_i32 = arith.constant 128 : i32
    %18 = arith.muli %arg0, %c128_i32 : i32
    %19 = vector.broadcast %18 : i32 to vector<8x128xi32>
    %20 = arith.addi %17, %19 : vector<8x128xi32>
    %21 = vector.broadcast %4 : vector<8x1xi32> to vector<8x128xi32>
    %22 = arith.cmpi eq, %20, %21 : vector<8x128xi32>
    %cst_10 = arith.constant 1.000000e-01 : f32
    %23 = vector.broadcast %cst_10 : f32 to vector<8x128xf32>
    %24 = arith.addf %16, %23 : vector<8x128xf32>
    %cst_11 = arith.constant 3.200000e+01 : f32
    %25 = vector.broadcast %cst_11 : f32 to vector<8x128xf32>
    %26 = arith.mulf %25, %24 : vector<8x128xf32>
    %27 = math.exp %26 : vector<8x128xf32>
    %28 = vector.broadcast %5 : vector<8x1xf32> to vector<8x128xf32>
    %29 = arith.mulf %28, %27 : vector<8x128xf32>
    %cst_12 = arith.constant 0.000000e+00 : f32
    %30 = vector.broadcast %cst_12 : f32 to vector<8x128xf32>
    %31 = arith.select %22, %16, %30 : vector<8x128xi1>, vector<8x128xf32>
    %cst_13 = arith.constant dense<0.000000e+00> : vector<8xf32>
    %32 = vector.multi_reduction <add>, %31, %cst_13 [1] : vector<8x128xf32> to vector<8xf32>
    %33 = vector.shape_cast %32 : vector<8xf32> to vector<8x1xf32>
    %cst_14 = arith.constant 1.000000e-01 : f32
    %34 = vector.broadcast %cst_14 : f32 to vector<8x1xf32>
    %35 = arith.subf %33, %34 : vector<8x1xf32>
    %cst_15 = arith.constant -3.200000e+01 : f32
    %36 = vector.broadcast %cst_15 : f32 to vector<8x1xf32>
    %37 = arith.mulf %36, %35 : vector<8x1xf32>
    %38 = math.exp %37 : vector<8x1xf32>
    %39 = arith.mulf %5, %38 : vector<8x1xf32>
    %c0_16 = arith.constant 0 : index
    %c0_17 = arith.constant 0 : index
    %40 = vector.load %arg8[%c0_16, %c0_17] : memref<1x128xf32, #tpu.memory_space<vmem>>, vector<1x128xf32>
    %cst_18 = arith.constant 0.000000e+00 : f32
    %41 = vector.shape_cast %39 : vector<8x1xf32> to vector<8x1xf32>
    %42 = vector.broadcast %41 : vector<8x1xf32> to vector<8x128xf32>
    %43 = vector.broadcast %cst_18 : f32 to vector<8x128xf32>
    %44 = arith.select %22, %42, %43 : vector<8x128xi1>, vector<8x128xf32>
    %cst_19 = arith.constant dense<0.000000e+00> : vector<128xf32>
    %45 = vector.multi_reduction <add>, %44, %cst_19 [0] : vector<8x128xf32> to vector<128xf32>
    %46 = vector.shape_cast %45 : vector<128xf32> to vector<1x128xf32>
    %47 = arith.addf %40, %46 : vector<1x128xf32>
    %c0_20 = arith.constant 0 : index
    %c0_21 = arith.constant 0 : index
    %48 = vector.load %arg8[%c0_20, %c0_21] : memref<1x128xf32, #tpu.memory_space<vmem>>, vector<1x128xf32>
    tpu.vector_store %arg8[%c0_20, %c0_21], %47 {strides = array<i32>} : memref<1x128xf32, #tpu.memory_space<vmem>>, vector<1x128xf32>,
    %c0_22 = arith.constant 0 : index
    %c0_23 = arith.constant 0 : index
    %49 = vector.load %arg9[%c0_22, %c0_23] : memref<1x128xf32, #tpu.memory_space<vmem>>, vector<1x128xf32>
    %cst_24 = arith.constant 0.000000e+00 : f32
    %50 = vector.broadcast %cst_24 : f32 to vector<8x128xf32>
    %51 = arith.select %22, %50, %29 : vector<8x128xi1>, vector<8x128xf32>
    %cst_25 = arith.constant dense<0.000000e+00> : vector<128xf32>
    %52 = vector.multi_reduction <add>, %51, %cst_25 [0] : vector<8x128xf32> to vector<128xf32>
    %53 = vector.shape_cast %52 : vector<128xf32> to vector<1x128xf32>
    %54 = arith.addf %49, %53 : vector<1x128xf32>
    %c0_26 = arith.constant 0 : index
    %c0_27 = arith.constant 0 : index
    %55 = vector.load %arg9[%c0_26, %c0_27] : memref<1x128xf32, #tpu.memory_space<vmem>>, vector<1x128xf32>
    tpu.vector_store %arg9[%c0_26, %c0_27], %54 {strides = array<i32>} : memref<1x128xf32, #tpu.memory_space<vmem>>, vector<1x128xf32>,
    %c2_i32 = arith.constant 2 : i32
    %56 = arith.cmpi eq, %arg1, %c2_i32 : i32
    %57 = arith.extui %56 : i1 to i32
    %c0_i32_28 = arith.constant 0 : i32
    %58 = arith.cmpi ne, %57, %c0_i32_28 : i32
    scf.if %58 {
      %59 = tpu.iota {dimensions = array<i32: 1>} : vector<1x128xi32>
      %c128_i32_29 = arith.constant 128 : i32
      %60 = arith.muli %arg0, %c128_i32_29 : i32
      %61 = vector.broadcast %60 : i32 to vector<1x128xi32>
      %62 = arith.addi %59, %61 : vector<1x128xi32>
      %c200_i32 = arith.constant 200 : i32
      %63 = vector.broadcast %c200_i32 : i32 to vector<1x128xi32>
      %64 = arith.cmpi slt, %62, %63 : vector<1x128xi32>
      %c0_30 = arith.constant 0 : index
      %c0_31 = arith.constant 0 : index
      %65 = vector.load %arg8[%c0_30, %c0_31] : memref<1x128xf32, #tpu.memory_space<vmem>>, vector<1x128xf32>
      %cst_32 = arith.constant 1.000000e+00 : f32
      %66 = vector.broadcast %cst_32 : f32 to vector<1x128xf32>
      %67 = arith.addf %66, %65 : vector<1x128xf32>
      %68 = math.log %67 : vector<1x128xf32>
      %c0_33 = arith.constant 0 : index
      %c0_34 = arith.constant 0 : index
      %69 = vector.load %arg6[%c0_33, %c0_34] : memref<1x128xf32, #tpu.memory_space<vmem>>, vector<1x128xf32>
      tpu.vector_store %arg6[%c0_33, %c0_34], %68 {strides = array<i32>} : memref<1x128xf32, #tpu.memory_space<vmem>>, vector<1x128xf32>,
      %c0_35 = arith.constant 0 : index
      %c0_36 = arith.constant 0 : index
      %70 = vector.load %arg9[%c0_35, %c0_36] : memref<1x128xf32, #tpu.memory_space<vmem>>, vector<1x128xf32>
      %cst_37 = arith.constant 1.000000e+00 : f32
      %71 = vector.broadcast %cst_37 : f32 to vector<1x128xf32>
      %72 = arith.addf %71, %70 : vector<1x128xf32>
      %73 = math.log %72 : vector<1x128xf32>
      %cst_38 = arith.constant 0.000000e+00 : f32
      %74 = vector.broadcast %cst_38 : f32 to vector<1x128xf32>
      %75 = arith.select %64, %73, %74 : vector<1x128xi1>, vector<1x128xf32>
      %c0_39 = arith.constant 0 : index
      %c0_40 = arith.constant 0 : index
      %76 = vector.load %arg7[%c0_39, %c0_40] : memref<1x128xf32, #tpu.memory_space<vmem>>, vector<1x128xf32>
      tpu.vector_store %arg7[%c0_39, %c0_40], %75 {strides = array<i32>} : memref<1x128xf32, #tpu.memory_space<vmem>>, vector<1x128xf32>,
    } else {
    }
    return
  }
  func.func @transform_0(%arg0: i32, %arg1: i32) -> (i32, i32) {
    %c0_i32 = arith.constant 0 : i32
    %c0_i32_0 = arith.constant 0 : i32
    return %arg1, %c0_i32 : i32, i32
  }
  func.func @transform_1(%arg0: i32, %arg1: i32) -> (i32, i32) {
    %c0_i32 = arith.constant 0 : i32
    %c0_i32_0 = arith.constant 0 : i32
    return %arg0, %c0_i32 : i32, i32
  }
  func.func @transform_2(%arg0: i32, %arg1: i32) -> (i32, i32) {
    %c0_i32 = arith.constant 0 : i32
    %c0_i32_0 = arith.constant 0 : i32
    return %arg1, %c0_i32 : i32, i32
  }
  func.func @transform_3(%arg0: i32, %arg1: i32) -> (i32, i32) {
    %c0_i32 = arith.constant 0 : i32
    %c0_i32_0 = arith.constant 0 : i32
    return %arg1, %c0_i32 : i32, i32
  }
  func.func @transform_4(%arg0: i32, %arg1: i32) -> (i32, i32) {
    %c0_i32 = arith.constant 0 : i32
    %c0_i32_0 = arith.constant 0 : i32
    return %c0_i32, %arg0 : i32, i32
  }
  func.func @transform_5(%arg0: i32, %arg1: i32) -> (i32, i32) {
    %c0_i32 = arith.constant 0 : i32
    %c0_i32_0 = arith.constant 0 : i32
    return %c0_i32, %arg0 : i32, i32
  }
}

</mosaic_0001>

<bundles_post_ra>
// kernel: tpu_custom_call.1
= control target key start
LH: loop header
LB: loop body
LE: loop exit
PB: predicated region body
PF: predicated region fallthrough
CT: control target
= control target key end

     0   :  { %11 = vsyncpa [#allocation6], 0  ;;  %s1596_s0 = inlined_call_operand.vmem [shape: f32[24,32], index: 0, kind: input, shape index: {}]   ;;  %s1597_s1 = inlined_call_operand.vmem [shape: f32[256,32], index: 1, kind: input, shape index: {}]   ;;  %s1598_s2 = inlined_call_operand.vmem [shape: s32[24,1], index: 2, kind: input, shape index: {}]   ;;  %s1599_s3 = inlined_call_operand.vmem [shape: f32[24,1], index: 3, kind: input, shape index: {}]   ;;  %s1600_s4 = inlined_call_operand.hbm [shape: f32[1,256], index: 4, kind: output, shape index: {0}]   ;;  %s1601_s5 = inlined_call_operand.hbm [shape: f32[1,256], index: 5, kind: output, shape index: {1}]  }
   0x1   :  { %13 = vsyncpa [#allocation6 + $0x1], 0 }
   0x2   :  { %14 = vsyncpa [#allocation8], 0 }
   0x3   :  { %16 = vsyncpa [#allocation8 + $0x1], 0  ;;  %s1233_s18 = smov 0   ;;  %s1235_s19 = smov 0  }
   0x4   :  { %s1237_s20 = smov 0   ;;  %s1239_s21 = smov 0  }
   0x5   :  { %s1241_s22 = smov 0   ;;  %s1243_s23 = smov 0  }
   0x6   :  { %s1245_s24 = smov 0   ;;  %s1247_s25 = smov 0  }
   0x7 LB: > { %1607 = sst [smem:[#allocation11_spill]] %s1170_s19  ;;  %s824_s26 = sadd.s32 4294967295, %s1194_s25   ;;  %s1194_s25 = sphi %s1247_s25, %s22_s25   ;;  %s1190_s24 = sphi %s1245_s24, %s1624_s24   ;;  %s1186_s23 = sphi %s1243_s23, %s1623_s23   ;;  %s1182_s22 = sphi %s1241_s22, %s1622_s22   ;;  %s1178_s21 = sphi %s1239_s21, %s1621_s21   ;;  %s1174_s20 = sphi %s1237_s20, %s1620_s20   ;;  %s1170_s19 = sphi %s1235_s19, %s1619_s19   ;;  %s1166_s18 = sphi %s1233_s18, %s1618_s18  }
   0x8   : > { %1608 = sst [smem:[#allocation12_spill]] %s1174_s20  ;;  %s825_s27 = sadd.s32 4294967294, %s1194_s25  }
   0x9   : > { %1609 = sst [smem:[#allocation13_spill]] %s1186_s23  ;;  %s31_s28 = sadd.s32 1, %s1186_s23 }
   0xa   : > { %1610 = sst [smem:[#allocation14_spill]] %s1190_s24  ;;  %p32_p0 = scmp.ge.s32.totalorder %s31_s28, 3 }
   0xb   : > { %s34_s29 = sadd.s32 1, %s1190_s24  ;;  %p155_p1 = scmp.ne.s32.totalorder %s1174_s20, %s1170_s19 }
   0xc   : > { %p156_p2 = scmp.eq.s32.totalorder %s824_s26, 5  ;;  %s1626_s28 = smov (%p32_p0, %s31_s28), 0 }
   0xd   : > { %1611 = sst [smem:[#allocation15_spill]] %s1626_s28  ;;  %s1628_s29 = smov (!%p32_p0, %s34_s29), %s1190_s24 }
   0xe   : > { %p1282_p3 = por %p156_p2, %p155_p1  ;;  %p161_p4 = scmp.ne.s32.totalorder %s1170_s19, %s1166_s18 }
   0xf   : > { %p36_p5 = scmp.ge.s32.totalorder %s1628_s29, 2  ;;  %p162_p6 = scmp.eq.s32.totalorder %s825_s27, 5 }
  0x10   : > { %p828_p7 = scmp.ge.s32.totalorder %s1194_s25, 1  ;;  %p236_p8 = scmp.lt.s32.totalorder %s1194_s25, 7 }
  0x11   : > { %s1630_s29 = smov (%p36_p5, %s1628_s29), 0  ;;  %p1292_p9 = por %p162_p6, %p161_p4 }
  0x12   : > { %1613 = sst [smem:[#allocation16_spill]] %s1630_s29  ;;  %p237_p10 = pnand %p828_p7, %p236_p8 }
  0x13   : > { %s142_s7 = ssub.s32 %s1190_s24, %s1630_s29  ;;  %s145_s8 = sadd.s32 1, %s1174_s20 }
  0x14   : > { %p143_p11 = scmp.eq.s32.totalorder %s142_s7, 0  ;;  %240 = sbr.rel (%p237_p10) target bundleno = 975 (0x3cf), region = 36 }
  0x15   : > { %s1303_s10 = sand.u32 (!%p237_p10), 1, %s1170_s19   ;;  %p279_p12 = scmp.lt.s32.totalorder (!%p237_p10), %s1178_s21, 2 }
  0x16   : > { %s1300_s9 = scalar_select %p143_p11, %s1174_s20, %s145_s8  }
  0x17   : > { %s1308_s12 = sshll.u32 (!%p237_p10), %s1182_s22, 4  ;;  %s272_s20 = scalar_lea.vmem (!%p237_p10), [#allocation5], %s1303_s10 }
  0x18   : > { %1615 = sst [smem:[#allocation17_spill]] %s1300_s9  ;;  %p284_p13 = scmp.lt.s32.totalorder (!%p237_p10), %s1308_s12, 31 }
  0x19   : > { %s278_s19 = scalar_lea.vmem (!%p237_p10), [#allocation7], %s1303_s10  ;;  %p834_p0 = scmp.ne.s32.totalorder (!%p237_p10), %s1178_s21, 0 }
  0x1b   : > { %s280_s11 = scalar_select %p279_p12, %s1178_s21, 2 }
  0x1c   : > { %s285_s7 = scalar_select %p284_p13, %s1308_s12, 31 }
  0x1d   : > { %s1310_s13 = sshll.u32 %s280_s11, 3  ;;  %300 = sbr.rel (%p834_p0) target bundleno = 224 (0xe0), region = 40  ;;  %vm335_vm0 = vcmask (!%p834_p0), 261120   ;;  %v1196_v48 = vmov (!%p834_p0), 0.0  }
  0x1e   : > { %s282_s16 = scalar_lea.vmem %s1596_s0, %s1310_s13  ;;  %s292_s27 = scalar_lea.vmem %s1598_s2, %s1310_s13  ;;  %301 = vst [vmem:[#allocation2] sm:$0x1] (!%p834_p0), %v1196_v48  ;;  %302 = vst [vmem:[#allocation3] sm:$0x1] (!%p834_p0), %v1196_v48 }
  0x1f   : > { %s296_s28 = scalar_lea.vmem %s1599_s3, %s1310_s13  ;;  %s831_s24 = sshll.u32 %s285_s7, 3 }
  0x20   : > { %s1329_s9 = scalar_lea.vmem %s1597_s1, %s831_s24 }
  0x21   : > { %v1335_v0 = vld [vmem:[%s1329_s9 + $0x10] sm:$0xff] (!%p834_p0)  ;;  %v1338_v1 = vld [vmem:[%s1329_s9] sm:$0xff] (!%p834_p0)  ;;  %v1341_v2 = vld [vmem:[%s1329_s9 + $0x18] sm:$0xff] (!%p834_p0) }
  0x22   : > { %v321_v3 = vmul.f32 (!%p834_p0), %v1335_v0, %v1335_v0  ;;  %v319_v4 = vmul.f32 (!%p834_p0), %v1338_v1, %v1338_v1  ;;  %v322_v5 = vmul.f32 (!%p834_p0), %v1341_v2, %v1341_v2  ;;  %v1350_v6 = vld [vmem:[%s1329_s9 + $0x8] sm:$0xff] (!%p834_p0)  ;;  %v1358_v9 = vld [vmem:[%s1329_s9 + $0x20] sm:$0xff] (!%p834_p0)  ;;  %v1369_v16 = vld [vmem:[%s1329_s9 + $0x38] sm:$0xff] (!%p834_p0) }
  0x23   : > { %v320_v7 = vmul.f32 (!%p834_p0), %v1350_v6, %v1350_v6  ;;  %v1355_v8 = vld [vmem:[%s1329_s9 + $0x28] sm:$0xff] (!%p834_p0)  ;;  %v323_v15 = vmul.f32 (!%p834_p0), %v1358_v9, %v1358_v9  ;;  %v1372_v17 = vld [vmem:[%s1329_s9 + $0x30] sm:$0xff] (!%p834_p0)  ;;  %v326_v20 = vmul.f32 (!%p834_p0), %v1369_v16, %v1369_v16  ;;  %v1384_v23 = vld [vmem:[%s1329_s9 + $0x40] sm:$0xff] (!%p834_p0) }
  0x24   : > { %v342_v10 = vsel %vm335_vm0, %v321_v3, 0.0  ;;  %v336_v11 = vsel %vm335_vm0, %v319_v4, 0.0  ;;  %v345_v12 = vsel %vm335_vm0, %v322_v5, 0.0  ;;  %v324_v14 = vmul.f32 %v1355_v8, %v1355_v8  ;;  %v1381_v22 = vld [vmem:[%s1329_s9 + $0x48] sm:$0xff]  ;;  %v1393_v28 = vld [vmem:[%s1329_s9 + $0x58] sm:$0xff]  ;;  %v1396_v29 = vld [vmem:[%s1329_s9 + $0x50] sm:$0xff] }
  0x25   : > { %343 = vadd.xlane.f32.xlu1 %v342_v10  ;;  %337 = vadd.xlane.f32.xlu0 %v336_v11  ;;  %v339_v13 = vsel %vm335_vm0, %v320_v7, 0.0  ;;  %v348_v19 = vsel %vm335_vm0, %v323_v15, 0.0  ;;  %v325_v21 = vmul.f32 %v1372_v17, %v1372_v17  ;;  %v357_v24 = vsel %vm335_vm0, %v326_v20, 0.0  ;;  %v1405_v34 = vld [vmem:[%s1329_s9 + $0x68] sm:$0xff]  ;;  %v1408_v35 = vld [vmem:[%s1329_s9 + $0x60] sm:$0xff]  ;;  %v1417_v40 = vld [vmem:[%s1329_s9 + $0x78] sm:$0xff] }
  0x26   : > { %v351_v18 = vsel %vm335_vm0, %v324_v14, 0.0  ;;  %v328_v26 = vmul.f32 %v1381_v22, %v1381_v22  ;;  %v327_v27 = vmul.f32 %v1384_v23, %v1384_v23  ;;  %v330_v32 = vmul.f32 %v1393_v28, %v1393_v28  ;;  %v1420_v41 = vld [vmem:[%s1329_s9 + $0x70] sm:$0xff] }
  0x27   : > { %v354_v25 = vsel %vm335_vm0, %v325_v21, 0.0  ;;  %v329_v33 = vmul.f32 %v1396_v29, %v1396_v29  ;;  %v332_v38 = vmul.f32 %v1405_v34, %v1405_v34  ;;  %v331_v39 = vmul.f32 %v1408_v35, %v1408_v35 }
  0x28   : > { %v363_v30 = vsel %vm335_vm0, %v328_v26, 0.0  ;;  %v360_v31 = vsel %vm335_vm0, %v327_v27, 0.0  ;;  %v369_v36 = vsel %vm335_vm0, %v330_v32, 0.0  ;;  %v334_v44 = vmul.f32 %v1417_v40, %v1417_v40 }
  0x29   : > { %346 = vadd.xlane.f32.xlu1 %v345_v12  ;;  %340 = vadd.xlane.f32.xlu0 %v339_v13  ;;  %v366_v37 = vsel %vm335_vm0, %v329_v33, 0.0  ;;  %v375_v42 = vsel %vm335_vm0, %v332_v38, 0.0  ;;  %v372_v43 = vsel %vm335_vm0, %v331_v39, 0.0  ;;  %v333_v45 = vmul.f32 %v1420_v41, %v1420_v41 }
  0x2a   : > { %v381_v46 = vsel %vm335_vm0, %v334_v44, 0.0 }
  0x2b   : > { %v378_v47 = vsel %vm335_vm0, %v333_v45, 0.0 }
  0x2d   : > { %352 = vadd.xlane.f32.xlu1 %v351_v18  ;;  %349 = vadd.xlane.f32.xlu0 %v348_v19 }
  0x31   : > { %358 = vadd.xlane.f32.xlu1 %v357_v24  ;;  %355 = vadd.xlane.f32.xlu0 %v354_v25 }
  0x35   : > { %364 = vadd.xlane.f32.xlu1 %v363_v30  ;;  %361 = vadd.xlane.f32.xlu0 %v360_v31 }
  0x39   : > { %370 = vadd.xlane.f32.xlu1 %v369_v36  ;;  %367 = vadd.xlane.f32.xlu0 %v366_v37 }
  0x3d   : > { %376 = vadd.xlane.f32.xlu1 %v375_v42  ;;  %373 = vadd.xlane.f32.xlu0 %v372_v43 }
  0x41   : > { %382 = vadd.xlane.f32.xlu1 %v381_v46  ;;  %379 = vadd.xlane.f32.xlu0 %v378_v47 }
  0xb2   : > { %v344_v49 = vpop.xlane.xlu1 %343  ;;  %v338_v50 = vpop.xlane.xlu0 %337 }
  0xb3   : > { %v386_v51 = vmax.f32 %v344_v49, 1e-24  ;;  %v384_v52 = vmax.f32 %v338_v50, 1e-24 }
  0xb5   : > { %1024 = vrsqrt.f32 %v386_v51 }
  0xb6   : > { %1026 = vrsqrt.f32 %v384_v52  ;;  %v347_v53 = vpop.xlane.xlu1 %346  ;;  %v341_v54 = vpop.xlane.xlu0 %340 }
  0xb7   : > { %v387_v55 = vmax.f32 %v347_v53, 1e-24  ;;  %v385_v56 = vmax.f32 %v341_v54, 1e-24 }
  0xb9   : > { %1028 = vrsqrt.f32 %v387_v55 }
  0xba   : > { %1030 = vrsqrt.f32 %v385_v56  ;;  %v353_v57 = vpop.xlane.xlu1 %352  ;;  %v350_v58 = vpop.xlane.xlu0 %349 }
  0xbb   : > { %v389_v59 = vmax.f32 %v353_v57, 1e-24  ;;  %v388_v60 = vmax.f32 %v350_v58, 1e-24 }
  0xbd   : > { %1032 = vrsqrt.f32 %v389_v59 }
  0xbe   : > { %1034 = vrsqrt.f32 %v388_v60  ;;  %v359_v61 = vpop.xlane.xlu1 %358  ;;  %v356_v62 = vpop.xlane.xlu0 %355 }
  0xbf   : > { %v1025_v63 = vpop.eup %1024  ;;  %v391_v3 = vmax.f32 %v359_v61, 1e-24  ;;  %v390_v4 = vmax.f32 %v356_v62, 1e-24 }
  0xc0   : > { %v1027_v5 = vpop.eup %1026  ;;  %v418_v7 = vmul.f32 %v1025_v63, %v1335_v0 }
  0xc1   : > { %v416_v10 = vmul.f32 %v1027_v5, %v1338_v1  ;;  %1036 = vrsqrt.f32 %v391_v3 }
  0xc2   : > { %434 = vst.msk [vmem:[#allocation4 + $0x10] sm:$0xff] %vm335_vm0, %v418_v7  ;;  %1038 = vrsqrt.f32 %v390_v4  ;;  %v365_v11 = vpop.xlane.xlu1 %364  ;;  %v362_v12 = vpop.xlane.xlu0 %361 }
  0xc3   : > { %v1029_v13 = vpop.eup %1028  ;;  %432 = vst.msk [vmem:[#allocation4] sm:$0xff] %vm335_vm0, %v416_v10  ;;  %v393_v14 = vmax.f32 %v365_v11, 1e-24  ;;  %v392_v15 = vmax.f32 %v362_v12, 1e-24 }
  0xc4   : > { %v1031_v18 = vpop.eup %1030  ;;  %v419_v19 = vmul.f32 %v1029_v13, %v1341_v2 }
  0xc5   : > { %v417_v20 = vmul.f32 %v1031_v18, %v1350_v6  ;;  %1040 = vrsqrt.f32 %v393_v14 }
  0xc6   : > { %435 = vst.msk [vmem:[#allocation4 + $0x18] sm:$0xff] %vm335_vm0, %v419_v19  ;;  %1042 = vrsqrt.f32 %v392_v15  ;;  %v371_v0 = vpop.xlane.xlu1 %370  ;;  %v368_v1 = vpop.xlane.xlu0 %367 }
  0xc7   : > { %v1033_v21 = vpop.eup %1032  ;;  %433 = vst.msk [vmem:[#allocation4 + $0x8] sm:$0xff] %vm335_vm0, %v417_v20  ;;  %v395_v24 = vmax.f32 %v371_v0, 1e-24  ;;  %v394_v25 = vmax.f32 %v368_v1, 1e-24 }
  0xc8   : > { %v1035_v26 = vpop.eup %1034  ;;  %v421_v27 = vmul.f32 %v1033_v21, %v1355_v8 }
  0xc9   : > { %v420_v30 = vmul.f32 %v1035_v26, %v1358_v9  ;;  %1044 = vrsqrt.f32 %v395_v24 }
  0xca   : > { %437 = vst.msk [vmem:[#allocation4 + $0x28] sm:$0xff] %vm335_vm0, %v421_v27  ;;  %1046 = vrsqrt.f32 %v394_v25  ;;  %v377_v2 = vpop.xlane.xlu1 %376  ;;  %v374_v6 = vpop.xlane.xlu0 %373 }
  0xcb   : > { %v1037_v31 = vpop.eup %1036  ;;  %436 = vst.msk [vmem:[#allocation4 + $0x20] sm:$0xff] %vm335_vm0, %v420_v30  ;;  %v397_v32 = vmax.f32 %v377_v2, 1e-24  ;;  %v396_v33 = vmax.f32 %v374_v6, 1e-24 }
  0xcc   : > { %v1039_v36 = vpop.eup %1038  ;;  %v423_v37 = vmul.f32 %v1037_v31, %v1369_v16 }
  0xcd   : > { %v422_v38 = vmul.f32 %v1039_v36, %v1372_v17  ;;  %1048 = vrsqrt.f32 %v397_v32 }
  0xce   : > { %439 = vst.msk [vmem:[#allocation4 + $0x38] sm:$0xff] %vm335_vm0, %v423_v37  ;;  %1050 = vrsqrt.f32 %v396_v33  ;;  %v383_v8 = vpop.xlane.xlu1 %382  ;;  %v380_v9 = vpop.xlane.xlu0 %379 }
  0xcf   : > { %v1041_v39 = vpop.eup %1040  ;;  %438 = vst.msk [vmem:[#allocation4 + $0x30] sm:$0xff] %vm335_vm0, %v422_v38  ;;  %v399_v42 = vmax.f32 %v383_v8, 1e-24  ;;  %v398_v43 = vmax.f32 %v380_v9, 1e-24 }
  0xd0   : > { %v1043_v44 = vpop.eup %1042  ;;  %v425_v45 = vmul.f32 %v1041_v39, %v1381_v22 }
  0xd1   : > { %v424_v46 = vmul.f32 %v1043_v44, %v1384_v23  ;;  %1052 = vrsqrt.f32 %v399_v42 }
  0xd2   : > { %441 = vst.msk [vmem:[#allocation4 + $0x48] sm:$0xff] %vm335_vm0, %v425_v45  ;;  %1054 = vrsqrt.f32 %v398_v43 }
  0xd3   : > { %v1045_v16 = vpop.eup %1044  ;;  %440 = vst.msk [vmem:[#allocation4 + $0x40] sm:$0xff] %vm335_vm0, %v424_v46 }
  0xd4   : > { %v1047_v17 = vpop.eup %1046  ;;  %v427_v47 = vmul.f32 %v1045_v16, %v1393_v28 }
  0xd5   : > { %v426_v48 = vmul.f32 %v1047_v17, %v1396_v29 }
  0xd6   : > { %443 = vst.msk [vmem:[#allocation4 + $0x58] sm:$0xff] %vm335_vm0, %v427_v47 }
  0xd7   : > { %v1049_v49 = vpop.eup %1048  ;;  %442 = vst.msk [vmem:[#allocation4 + $0x50] sm:$0xff] %vm335_vm0, %v426_v48 }
  0xd8   : > { %v1051_v22 = vpop.eup %1050  ;;  %v429_v23 = vmul.f32 %v1049_v49, %v1405_v34 }
  0xd9   : > { %v428_v50 = vmul.f32 %v1051_v22, %v1408_v35 }
  0xda   : > { %445 = vst.msk [vmem:[#allocation4 + $0x68] sm:$0xff] %vm335_vm0, %v429_v23 }
  0xdb   : > { %v1053_v51 = vpop.eup %1052  ;;  %444 = vst.msk [vmem:[#allocation4 + $0x60] sm:$0xff] %vm335_vm0, %v428_v50 }
  0xdc   : > { %v1055_v52 = vpop.eup %1054  ;;  %v431_v28 = vmul.f32 %v1053_v51, %v1417_v40 }
  0xdd   : > { %v430_v29 = vmul.f32 %v1055_v52, %v1420_v41 }
  0xde   : > { %447 = vst.msk [vmem:[#allocation4 + $0x78] sm:$0xff] %vm335_vm0, %v431_v28 }
  0xdf   : > { %446 = vst.msk [vmem:[#allocation4 + $0x70] sm:$0xff] %vm335_vm0, %v430_v29 }
  0xe0 PF: > { %v448_v34 = vld [vmem:[%s282_s16] sm:$0xff]  ;;  %vm452_vm1 = vcmask 261120   ;;  %v460_v53 = vld [vmem:[#allocation4 + $0x8] sm:$0xff]  ;;  %v1197_v41 = vmov 0.0|0.0   ;;  %v461_v57 = vld [vmem:[#allocation4 + $0x10] sm:$0xff]  ;;  %vm1198_vm3 = vmmov 0   ;;  %v596_v2 = vlaneseq }
  0xe1   : > { %v459_v35 = vld [vmem:[#allocation4] sm:$0xff]  ;;  %v451_v54 = vmul.f32 %v448_v34, %v448_v34  ;;  %vm1469_vm2 = vmpackc.low %vm452_vm1, %vm452_vm1  ;;  %911 = vmatprep.subr.bf16.mxu0 %v1197_v41  ;;  %v462_v58 = vld [vmem:[#allocation4 + $0x18] sm:$0xff]  ;;  %v1199_v4 = vmov 0.0   ;;  %v1200_v13 = vmov 0   ;;  %s852_s14 = sshll.u32 %s1182_s22, 7  ;;  %p854_p1 = scmp.ne.s32.totalorder %s1178_s21, 2 }
  0xe2   : > { %v912_v55 = vpack.c.bf16 %v460_v53, %v459_v35  ;;  %v916_v59 = vpack.c.bf16 %v462_v58, %v461_v57  ;;  %v463_v60 = vld [vmem:[#allocation4 + $0x20] sm:$0xff]  ;;  %v464_v61 = vld [vmem:[#allocation4 + $0x28] sm:$0xff]  ;;  %v465_v63 = vld [vmem:[#allocation4 + $0x30] sm:$0xff]  ;;  %908 = vmatprep.mubr.msk.f32.mxu0 %vm1198_vm3, %v1199_v4  ;;  %1056 = vset.pattern.permute.xlu0 %v1200_v13  ;;  %v597_v6 = vand.u32 127, %v596_v2  ;;  %v599_v31 = vstv %s852_s14 }
  0xe3   : > { %v453_v56 = vsel %vm452_vm1, %v451_v54, 0.0  ;;  %v920_v62 = vpack.c.bf16 %v464_v61, %v463_v60  ;;  %v466_v3 = vld [vmem:[#allocation4 + $0x38] sm:$0xff]  ;;  %v467_v7 = vld [vmem:[#allocation4 + $0x40] sm:$0xff]  ;;  %v468_v10 = vld [vmem:[#allocation4 + $0x48] sm:$0xff]  ;;  %1057 = vset.pattern.permute.xlu1 %v1200_v13 }
  0xe4   : > { %914 = vmatpush3.bf16.xpose.msk.msra.mxu0 %vm1469_vm2, %v912_v55  ;;  %454 = vadd.xlane.f32.xlu0 %v453_v56  ;;  %v924_v5 = vpack.c.bf16 %v466_v3, %v465_v63  ;;  %v928_v11 = vpack.c.bf16 %v468_v10, %v467_v7  ;;  %v449_v12 = vld [vmem:[%s292_s27] sm:$0xff]  ;;  %v469_v14 = vld [vmem:[#allocation4 + $0x50] sm:$0xff]  ;;  %v472_v20 = vld [vmem:[#allocation4 + $0x68] sm:$0xff]  ;;  %v600_v32 = vadd.s32 %v599_v31, %v597_v6 }
  0xe5   : > { %915 = vmatprep.subr.bf16.mxu0 %v1197_v41  ;;  %v470_v15 = vld [vmem:[#allocation4 + $0x58] sm:$0xff]  ;;  %v471_v19 = vld [vmem:[#allocation4 + $0x60] sm:$0xff] }
  0xe6   : > { %v932_v18 = vpack.c.bf16 %v470_v15, %v469_v14  ;;  %v936_v0 = vpack.c.bf16 %v472_v20, %v471_v19  ;;  %v473_v1 = vld [vmem:[#allocation4 + $0x70] sm:$0xff]  ;;  %v474_v21 = vld [vmem:[#allocation4 + $0x78] sm:$0xff]  ;;  %vm652_vm5 = vcmp.lt.s32.totalorder (!%p854_p1), %v600_v32, 200 }
  0xe7   : > { %v940_v24 = vpack.c.bf16 %v474_v21, %v473_v1  ;;  %v450_v8 = vld [vmem:[%s296_s28] sm:$0xff] }
  0xe8   : > { %v638_v28 = vld [vmem:[#allocation3] sm:$0x1]  ;;  %v623_v58 = vld [vmem:[#allocation2] sm:$0x1] }
  0xec   : > { %918 = vmatpush3.bf16.xpose.msk.msra.mxu0 %vm1469_vm2, %v916_v59 }
  0xed   : > { %919 = vmatprep.subr.bf16.mxu0 %v1197_v41 }
  0xf4   : > { %922 = vmatpush3.bf16.xpose.msk.msra.mxu0 %vm1469_vm2, %v920_v62 }
  0xf5   : > { %923 = vmatprep.subr.bf16.mxu0 %v1197_v41 }
  0xfa   : > { %602 = vperm.xlu0 %1056, %v449_v12  }
  0xfc   : > { %926 = vmatpush3.bf16.xpose.msk.msra.mxu0 %vm1469_vm2, %v924_v5 }
  0xfd   : > { %927 = vmatprep.subr.bf16.mxu0 %v1197_v41 }
 0x104   : > { %930 = vmatpush3.bf16.xpose.msk.msra.mxu0 %vm1469_vm2, %v928_v11 }
 0x105   : > { %931 = vmatprep.subr.bf16.mxu0 %v1197_v41 }
 0x10c   : > { %934 = vmatpush3.bf16.xpose.msk.msra.mxu0 %vm1469_vm2, %v932_v18 }
 0x10d   : > { %935 = vmatprep.subr.bf16.mxu0 %v1197_v41 }
 0x114   : > { %938 = vmatpush3.bf16.xpose.msk.msra.mxu0 %vm1469_vm2, %v936_v0 }
 0x115   : > { %939 = vmatprep.subr.bf16.mxu0 %v1197_v41 }
 0x11c   : > { %942 = vmatpush3.bf16.xpose.msk.msra.mxu0 %vm1469_vm2, %v940_v24 }
 0x171   : > { %v455_v25 = vpop.xlane.xlu0 %454 }
 0x172   : > { %v456_v26 = vmax.f32 %v455_v25, 1e-24 }
 0x174   : > { %1058 = vrsqrt.f32 %v456_v26 }
 0x179   : > { %v603_v33 = vpop.permute.xlu0 %602 }
 0x17a   : > { %vm604_vm4 = vcmp.eq.s32.totalorder %v600_v32, %v603_v33 }
 0x17e   : > { %v1059_v27 = vpop.eup %1058 }
 0x17f   : > { %v458_v30 = vmul.f32 %v1059_v27, %v448_v34 }
 0x181   : > { %909 = vmatmul.mubr.msk.f32.vlgmr.msra.gmra.mrb[0].mxu0 %vm452_vm1, %v458_v30 }
 0x254   : > { %v592_v36 = vpop.f32.mrb[0].mxu0 }
 0x255   : > { %v910_v37 = vpop.f32.mrb[1].mxu0  ;;  %v615_v38 = vsel %vm604_vm4, %v592_v36, 0.0  ;;  %v605_v9 = vadd.f32 0.1, %v592_v36 }
 0x256   : > { %616 = vadd.xlane.f32.xlu1 %v615_v38 }
 0x257   : > { %v606_v39 = vmul.f32 32.0, %v605_v9 }
 0x259   : > { %v607_v42 = vmul.f32 1.442695, %v606_v39 }
 0x25b   : > { %1060 = vpow2.f32 %v607_v42 }
 0x265   : > { %v1061_v46 = vpop.eup %1060 }
 0x267   : > { %611 = vperm.xlu1 %1057, %v450_v8  }
 0x2e3   : > { %v617_v43 = vpop.xlane.xlu1 %616 }
 0x2e4   : > { %v853_v44 = vadd.f32 -0.1, %v617_v43 }
 0x2e6   : > { %v619_v45 = vmul.f32 -32.0, %v853_v44 }
 0x2e7   : > { %v612_v16 = vpop.permute.xlu1 %611 }
 0x2e8   : > { %v620_v17 = vmul.f32 1.442695, %v619_v45  ;;  %v614_v47 = vmul.f32 %v1061_v46, %v612_v16 }
 0x2ea   : > { %1062 = vpow2.f32 %v620_v17  ;;  %v639_v48 = vsel %vm604_vm4, 0.0, %v614_v47 }
 0x2eb   : > { %v640_v49 = vrot.slane %v639_v48, 4 }
 0x2ed   : > { %v641_v22 = vadd.f32 %v640_v49, %v639_v48 }
 0x2ef   : > { %v642_v23 = vrot.slane %v641_v22, 2 }
 0x2f1   : > { %v643_v50 = vadd.f32 %v642_v23, %v641_v22 }
 0x2f3   : > { %v644_v51 = vrot.slane %v643_v50, 1 }
 0x2f4   : > { %v1063_v52 = vpop.eup %1062 }
 0x2f5   : > { %v645_v29 = vadd.f32 %v644_v51, %v643_v50  ;;  %v622_v34 = vmul.f32 %v1063_v52, %v450_v8 }
 0x2f7   : > { %v646_v35 = vadd.f32 %v645_v29, %v638_v28  ;;  %626 = vperm.xlu1 %1057, %v622_v34  }
 0x2f9   : > { %647 = vst [vmem:[#allocation3] sm:$0x1] %v646_v35 }
 0x300   : > { %v658_v62 = vld [vmem:[#allocation3] sm:$0x1] (!%p854_p1) }
 0x301   : > { %v659_v3 = vadd.f32 (!%p854_p1), 1.0, %v658_v62 }
 0x376   : > { %v627_v53 = vpop.permute.xlu1 %626 }
 0x377   : > { %v629_v54 = vsel %vm604_vm4, %v627_v53, 0.0 }
 0x378   : > { %v630_v40 = vrot.slane %v629_v54, 4 }
 0x37a   : > { %v631_v41 = vadd.f32 %v630_v40, %v629_v54 }
 0x37c   : > { %v632_v55 = vrot.slane %v631_v41, 2 }
 0x37e   : > { %v633_v56 = vadd.f32 %v632_v55, %v631_v41 }
 0x380   : > { %v634_v57 = vrot.slane %v633_v56, 1  ;;  %651 = sbr.rel (%p854_p1) target bundleno = 928 (0x3a0), region = 44 }
 0x382   : > { %v635_v59 = vadd.f32 %v634_v57, %v633_v56 }
 0x384   : > { %v636_v60 = vadd.f32 %v635_v59, %v623_v58 }
 0x386   : > { %637 = vst [vmem:[#allocation2] sm:$0x1] %v636_v60 }
 0x38d   : > { %v653_v61 = vld [vmem:[#allocation2] sm:$0x1] }
 0x38e   : > { %v654_v63 = vadd.f32 1.0, %v653_v61 }
 0x390   : > { %1064 = vlog2.f32 %v654_v63 }
 0x391   : > { %1066 = vlog2.f32 %v659_v3 }
 0x39a   : > { %v1065_v4 = vpop.eup %1064 }
 0x39b   : > { %v1067_v5 = vpop.eup %1066  ;;  %v656_v7 = vmul.f32 0.6931472, %v1065_v4 }
 0x39c   : > { %v661_v10 = vmul.f32 0.6931472, %v1067_v5 }
 0x39d   : > { %657 = vst [vmem:[%s272_s20] sm:$0x1] %v656_v7 }
 0x39e   : > { %v662_v11 = vsel %vm652_vm5, %v661_v10, 0.0 }
 0x39f   : > { %663 = vst [vmem:[%s278_s19] sm:$0x1] %v662_v11 }
 0x3a0 PF: > { %s1514_s28 = scalar_lea.hbm %s1600_s4, %s1308_s12  ;;  %s681_s13 = sshll.u32 %s272_s20, 4  ;;  %s1518_s13 = int_to_ptr.vmem [resolvable:$true] %s681_s13 }
 0x3a1   : > { %s1524_s27 = scalar_lea.hbm %s1601_s5, %s1308_s12  ;;  %s665_s7 = scalar_lea.sflag [#allocation6], %s1303_s10 }
 0x3a2   : > { %s1068_s8 = scalar_lea.vmem %s1518_s13, 16  ;;  %s1201_s11 = smov [#allocation5]  }
 0x3a3   : > { %p1069_p2 = scmp.ne.s32.totalorder %s1518_s13, %s1068_s8  ;;  %s1072_s23 = sshll.u32 %s1201_s11, 4  ;;  %s1073_s23 = int_to_ptr.vmem [resolvable:$false] %s1072_s23 }
 0x3a4   : > { %s1074_s20 = scalar_lea.vmem %s1073_s23, 32  ;;  %p1075_p6 = scmp.lt.s32.totalorder %s1518_s13, %s1073_s23 }
 0x3a5   : > { %p1070_p4 = pnand %p1069_p2, %p1282_p3  ;;  %p1076_p7 = scmp.lt.s32.totalorder %s1074_s20, %s1068_s8 }
 0x3a7   : > { %p1071_p5 = pneg %p1070_p4  ;;  %p1077_p8 = por %p1076_p7, %p1075_p6 }
 0x3a9   : > { %p1078_p10 = pnand %p1077_p8, %p1071_p5 }
 0x3ab   : > { %1081 = shalt.err (!%p1078_p10)
}
 0x3ac   : > { %s1082_s12 = scalar_lea.hbm %s1514_s28, 16  ;;  %s1086_s9 = scalar_lea.hbm %s1600_s4, 32 }
 0x3ad   : > { %p1083_p11 = scmp.ne.s32.totalorder %s1514_s28, %s1082_s12  ;;  %p1087_p0 = scmp.lt.u32.totalorder %s1514_s28, %s1600_s4 }
 0x3ae   : > { %p1088_p1 = scmp.lt.u32.totalorder %s1086_s9, %s1082_s12  ;;  %p1090_p4 = scmp.lt.u32.totalorder %s1082_s12, %s1514_s28 }
 0x3af   : > { %p1084_p12 = pnand %p1083_p11, %p1282_p3 }
 0x3b0   : > { %p1089_p2 = por %p1088_p1, %p1087_p0 }
 0x3b1   : > { %p1085_p13 = pneg %p1084_p12 }
 0x3b2   : > { %p1091_p5 = por %p1090_p4, %p1089_p2 }
 0x3b4   : > { %p1092_p6 = pnand %p1091_p5, %p1085_p13 }
 0x3b6   : > { %1095 = shalt.err (!%p1092_p6)
}
 0x3b7   : > { %943 = dma.vmem_to_hbm [thread:$0]  (%p1282_p3), %s1518_s13, 16, %s1514_s28, %s665_s7  }
 0x3b8   : > { %s694_s16 = sshll.u32 %s278_s19, 4  ;;  %s669_s21 = scalar_lea.sflag [#allocation8], %s1303_s10  ;;  %s695_s16 = int_to_ptr.vmem [resolvable:$true] %s694_s16 }
 0x3b9   : > { %s1096_s22 = scalar_lea.vmem %s695_s16, 16  ;;  %s1202_s17 = smov [#allocation7]  }
 0x3ba   : > { %p1097_p7 = scmp.ne.s32.totalorder %s695_s16, %s1096_s22  ;;  %s1100_s26 = sshll.u32 %s1202_s17, 4  ;;  %s1101_s26 = int_to_ptr.vmem [resolvable:$false] %s1100_s26 }
 0x3bb   : > { %s1102_s8 = scalar_lea.vmem %s1101_s26, 32  ;;  %p1103_p11 = scmp.lt.s32.totalorder %s695_s16, %s1101_s26 }
 0x3bc   : > { %p1098_p8 = pnand %p1097_p7, %p1282_p3  ;;  %p1104_p12 = scmp.lt.s32.totalorder %s1102_s8, %s1096_s22 }
 0x3be   : > { %p1099_p10 = pneg %p1098_p8  ;;  %p1105_p13 = por %p1104_p12, %p1103_p11 }
 0x3c0   : > { %p1106_p0 = pnand %p1105_p13, %p1099_p10 }
 0x3c2   : > { %1109 = shalt.err (!%p1106_p0)
}
 0x3c3   : > { %s1110_s19 = scalar_lea.hbm %s1524_s27, 16  ;;  %s1114_s13 = scalar_lea.hbm %s1601_s5, 32 }
 0x3c4   : > { %p1111_p1 = scmp.ne.s32.totalorder %s1524_s27, %s1110_s19  ;;  %p1115_p5 = scmp.lt.u32.totalorder %s1524_s27, %s1601_s5 }
 0x3c5   : > { %p1116_p6 = scmp.lt.u32.totalorder %s1114_s13, %s1110_s19  ;;  %p1118_p8 = scmp.lt.u32.totalorder %s1110_s19, %s1524_s27 }
 0x3c6   : > { %p1112_p2 = pnand %p1111_p1, %p1282_p3 }
 0x3c7   : > { %p1117_p7 = por %p1116_p6, %p1115_p5 }
 0x3c8   : > { %p1113_p4 = pneg %p1112_p2 }
 0x3c9   : > { %p1119_p10 = por %p1118_p8, %p1117_p7 }
 0x3cb   : > { %p1120_p11 = pnand %p1119_p10, %p1113_p4 }
 0x3cd   : > { %1123 = shalt.err (!%p1120_p11)
}
 0x3ce   : > { %944 = dma.vmem_to_hbm [thread:$0]  (%p1282_p3), %s695_s16, 16, %s1524_s27, %s669_s21  }
 0x3cf PF: > { %p954_p12 = scmp.ge.s32.totalorder %s1194_s25, 2  ;;  %s706_s23 = sand.u32 1, %s1166_s18  }
 0x3d0   : > { %s707_s20 = scalar_lea.sflag [#allocation6], %s706_s23 }
 0x3d1   : > { %p948_p13 = pnand %p954_p12, %p1292_p9 }
 0x3d3   : > { %1157 = dma.done.wait (!%p948_p13), %s707_s20, 16  }
 0x3d4   : > { %1159 = vsyncadd (!%p948_p13), %s707_s20, 4294967280  ;;  %s715_s12 = scalar_lea.sflag [#allocation8], %s706_s23 }
 0x3d5   : > { %1161 = dma.done.wait (!%p948_p13), %s715_s12, 16  }
 0x3d6   : > { %1163 = vsyncadd (!%p948_p13), %s715_s12, 4294967280  ;;  %s22_s25 = sadd.s32 1, %s1194_s25   ;;  %s1618_s18 = sld [smem:[#allocation11_spill]] }
 0x3d7   : > { %p19_p0 = scmp.ge.s32.totalorder %s22_s25, 8   ;;  %s1619_s19 = sld [smem:[#allocation12_spill]] }
 0x3d8   : > { %s1620_s20 = sld [smem:[#allocation17_spill]]  ;;  %s1621_s21 = sld [smem:[#allocation13_spill]] }
 0x3d9   : > { %s1622_s22 = sld [smem:[#allocation14_spill]]  ;;  %s1623_s23 = sld [smem:[#allocation15_spill]] }
 0x3da   : > { %s1624_s24 = sld [smem:[#allocation16_spill]]  ;;  %21 = sbr.rel (!%p19_p0) target bundleno = 7 (0x7), region = 105 }
 0x3e1   :  { %719 = vsyncpa [#allocation6], 1 }
 0x3e2   :  { %721 = vsyncpa [#allocation6 + $0x1], 1 }
 0x3e3   :  { %722 = vsyncpa [#allocation8], 1 }
 0x3e4   :  { %724 = vsyncpa [#allocation8 + $0x1], 1 }

</bundles_post_ra>
